<compile_context>
chip_gen: v6e
topology: v6e:2x2x1
jax: 0.10.0
libtpu: 0.0.40
codegen_flags: <defaults>
</compile_context>

<pallas_src>
import functools

import jax
import jax.numpy as jnp
from jax.experimental import pallas as pl
from jax.experimental.pallas import tpu as pltpu

BN_EPS = 1e-5
LANES = 128


def _round_up(n, m):
    return ((n + m - 1) // m) * m


def _multitask_fused_kernel(x_ref, w1_ref, gamma_ref, beta_ref, w2_ref, b2_ref,
                            out_ref):
    """Single grid step: all task heads fused via concatenated / block-diagonal weights."""
    # Linear 1 (no bias), all heads at once -- one bf16 MXU push, f32 accumulate.
    x = x_ref[...].astype(jnp.bfloat16)                               # (B, D)
    h = jnp.dot(x, w1_ref[...], preferred_element_type=jnp.float32)   # (B, TH) f32

    # BatchNorm1d (training-mode batch stats), one-pass sum / sum-of-squares,
    # normalize+affine fused into a single scale/shift (2 full-tile VPU ops).
    inv_b = 1.0 / h.shape[0]
    col_sum = jnp.sum(h, axis=0, keepdims=True)                       # (1, TH)
    col_sq = jnp.sum(h * h, axis=0, keepdims=True)                    # (1, TH)
    mean = col_sum * inv_b
    var = jnp.maximum(col_sq * inv_b - mean * mean, 0.0)              # biased variance
    scale = gamma_ref[...] * jax.lax.rsqrt(var + BN_EPS)              # (1, TH), EUP rsqrt
    shift = beta_ref[...] - mean * scale                              # (1, TH)
    h = jnp.maximum(h * scale + shift, 0.0)                           # BN affine + ReLU

    # Linear 2 (block-diagonal across heads) + bias -- one bf16 MXU push.
    logits = jnp.dot(h.astype(jnp.bfloat16), w2_ref[...],
                     preferred_element_type=jnp.float32)              # (B, Np) f32
    logits = logits + b2_ref[...]

    out_ref[...] = logits.astype(out_ref.dtype)                       # lane-dense store


def pack_multitask_params(w1, gamma, beta, w2, b2):
    """One-time packing of per-task parameters into fused kernel operands.

    w1: [T, D, H]; gamma/beta: [T, H]; w2: [T, H, C]; b2: [T, C].
    Call once when parameters change; pass the result to multitask_forward_packed.
    """
    T, D, H = w1.shape
    C = w2.shape[-1]
    TH = _round_up(T * H, LANES)      # total hidden width, padded only at the end
    Np = _round_up(T * C, LANES)      # total logits width, lane-dense
    f32 = jnp.float32

    # W1: concatenate heads tightly along the output axis, pad total to TH.
    w1_cat = jnp.transpose(w1.astype(f32), (1, 0, 2)).reshape(D, T * H)
    w1_cat = jnp.pad(w1_cat, ((0, 0), (0, TH - T * H))).astype(jnp.bfloat16)

    # BN affine: gamma padded with 1 (padded columns are exactly 0 so it is
    # irrelevant), beta padded with 0 so padded columns stay 0 through BN+ReLU.
    gamma_cat = jnp.pad(gamma.astype(f32).reshape(1, T * H),
                        ((0, 0), (0, TH - T * H)), constant_values=1.0)
    beta_cat = jnp.pad(beta.astype(f32).reshape(1, T * H),
                       ((0, 0), (0, TH - T * H)))

    # W2: block-diagonal (TH, Np); head t occupies rows [t*H, (t+1)*H) and
    # columns [t*C, (t+1)*C).  Built vectorized (no per-task update-slice loop).
    eye = jnp.eye(T, dtype=f32)
    w2_bd = jnp.einsum('thc,ts->thsc', w2.astype(f32), eye).reshape(T * H, T * C)
    w2_bd = jnp.pad(w2_bd, ((0, TH - T * H), (0, Np - T * C))).astype(jnp.bfloat16)

    b2_cat = jnp.pad(b2.astype(f32).reshape(1, T * C), ((0, 0), (0, Np - T * C)))

    packed = (w1_cat, gamma_cat, beta_cat, w2_bd, b2_cat)
    meta = dict(num_tasks=T, num_classes=C)
    return packed, meta


@functools.partial(jax.jit, static_argnames=("num_tasks", "num_classes"))
def multitask_forward_packed(x, packed, *, num_tasks, num_classes):
    """x: [B, D] float32; packed: output of pack_multitask_params.
    Returns [B, C, T] logits (same convention as the PyTorch module)."""
    w1_cat, gamma_cat, beta_cat, w2_bd, b2_cat = packed
    B, D = x.shape
    TH = w1_cat.shape[1]
    Np = w2_bd.shape[1]
    T, C = num_tasks, num_classes

    out_flat = pl.pallas_call(
        _multitask_fused_kernel,
        out_shape=jax.ShapeDtypeStruct((B, Np), x.dtype),
        grid_spec=pltpu.PrefetchScalarGridSpec(
            num_scalar_prefetch=0,
            grid=(1,),  # BN needs full-batch stats -> no naive batch tiling
            in_specs=[
                pl.BlockSpec((B, D), lambda i: (0, 0)),       # x
                pl.BlockSpec((D, TH), lambda i: (0, 0)),      # W1 (all heads, bf16)
                pl.BlockSpec((1, TH), lambda i: (0, 0)),      # gamma (f32)
                pl.BlockSpec((1, TH), lambda i: (0, 0)),      # beta  (f32)
                pl.BlockSpec((TH, Np), lambda i: (0, 0)),     # W2 block-diagonal (bf16)
                pl.BlockSpec((1, Np), lambda i: (0, 0)),      # b2 (f32)
            ],
            out_specs=pl.BlockSpec((B, Np), lambda i: (0, 0)),
        ),
        compiler_params=pltpu.CompilerParams(
            dimension_semantics=("arbitrary",),
            # Explicit scoped-VMEM budget; actual usage here is ~100 KiB so a
            # single block fits on v5e (16 MiB default) / v6e / v7x (64 MiB phys).
            vmem_limit_bytes=32 * 1024 * 1024,
        ),
    )(x, w1_cat, gamma_cat, beta_cat, w2_bd, b2_cat)

    # Glue: lane-dense (B, Np) -> [B, C, T] (module's output convention).
    out_btc = out_flat[:, :T * C].reshape(B, T, C)
    return jnp.transpose(out_btc, (0, 2, 1))


def multitask_forward(x, w1, gamma, beta, w2, b2):
    """Convenience wrapper (packs every call).  Prefer packing once and calling
    multitask_forward_packed in a real training/inference loop."""
    packed, meta = pack_multitask_params(w1, gamma, beta, w2, b2)
    return multitask_forward_packed(x, packed, **meta)


def reference_forward(x, w1, gamma, beta, w2, b2, matmul_dtype=jnp.float32):
    """Pure-JAX reference matching the PyTorch module (train-mode BN).
    matmul_dtype=bfloat16 mirrors the kernel's matmul-operand rounding."""
    def q(a):
        return a.astype(matmul_dtype).astype(jnp.float32)

    outs = []
    for t in range(w1.shape[0]):
        h = q(x) @ q(w1[t])
        mean = jnp.mean(h, axis=0, keepdims=True)
        var = jnp.mean((h - mean) ** 2, axis=0, keepdims=True)
        h = (h - mean) / jnp.sqrt(var + BN_EPS)
        h = h * gamma[t][None, :] + beta[t][None, :]
        h = jnp.maximum(h, 0.0)
        outs.append(q(h) @ q(w2[t]) + b2[t][None, :])   # (B, C)
    return jnp.stack(outs, axis=-1)                     # (B, C, T)


if __name__ == "__main__":
    # Small shapes consistent with the module's forward (x: [batch, input_dim]).
    B, D, H, C, T = 8, 32, 32, 8, 3   # batch, input_dim, hidden_dim, num_classes, num_tasks

    key = jax.random.PRNGKey(0)
    kx, kw1, kg, kb, kw2, kb2 = jax.random.split(key, 6)

    x = jax.random.normal(kx, (B, D), dtype=jnp.float32)

    # Deterministic synthetic parameters (per-task stacks).
    w1 = jax.random.normal(kw1, (T, D, H), dtype=jnp.float32) * (1.0 / jnp.sqrt(D))
    gamma = 1.0 + 0.1 * jax.random.normal(kg, (T, H), dtype=jnp.float32)
    beta = 0.1 * jax.random.normal(kb, (T, H), dtype=jnp.float32)
    w2 = jax.random.normal(kw2, (T, H, C), dtype=jnp.float32) * (1.0 / jnp.sqrt(H))
    b2 = 0.1 * jax.random.normal(kb2, (T, C), dtype=jnp.float32)

    # Pack once (cached across forward calls), then run the fused kernel.
    packed, meta = pack_multitask_params(w1, gamma, beta, w2, b2)
    out = multitask_forward_packed(x, packed, **meta)
    out = jax.block_until_ready(out)
    assert out.shape == (B, C, T), out.shape

    # Strict check against a reference that mirrors the kernel's bf16 matmul
    # operand rounding (f32 accumulation / BN in both).
    ref_bf16 = reference_forward(x, w1, gamma, beta, w2, b2, matmul_dtype=jnp.bfloat16)
    assert jnp.allclose(out, ref_bf16, atol=1e-3, rtol=1e-3), "mismatch vs bf16-mirrored reference"

    # Loose check against the full-f32 reference (bf16 weight rounding only).
    ref_f32 = reference_forward(x, w1, gamma, beta, w2, b2, matmul_dtype=jnp.float32)
    assert jnp.allclose(out, ref_f32, atol=3e-2, rtol=3e-2), "mismatch vs f32 reference"

    print("KERNEL_OK")
</pallas_src>

<mosaic_0001>
module attributes {stable_mosaic.version = 11 : i64} {
  func.func @_multitask_fused_kernel(%arg0: i32, %arg1: memref<8x32xf32, #tpu.memory_space<vmem>>, %arg2: memref<32x128xbf16, #tpu.memory_space<vmem>>, %arg3: memref<1x128xf32, #tpu.memory_space<vmem>>, %arg4: memref<1x128xf32, #tpu.memory_space<vmem>>, %arg5: memref<128x128xbf16, #tpu.memory_space<vmem>>, %arg6: memref<1x128xf32, #tpu.memory_space<vmem>>, %arg7: memref<8x128xf32, #tpu.memory_space<vmem>>) attributes {dimension_semantics = [#tpu.dimension_semantics<arbitrary>], iteration_bounds = array<i64: 1>, scalar_prefetch = 0 : i64, scratch_operands = 0 : i64, tpu.core_type = #tpu.core_type<tc>, window_params = [{pipeline_mode = #tpu.pipeline_mode<synchronous>, transform_indices = @transform_0, window_bounds = array<i64: 8, 32>}, {pipeline_mode = #tpu.pipeline_mode<synchronous>, transform_indices = @transform_1, window_bounds = array<i64: 32, 128>}, {pipeline_mode = #tpu.pipeline_mode<synchronous>, transform_indices = @transform_2, window_bounds = array<i64: 1, 128>}, {pipeline_mode = #tpu.pipeline_mode<synchronous>, transform_indices = @transform_3, window_bounds = array<i64: 1, 128>}, {pipeline_mode = #tpu.pipeline_mode<synchronous>, transform_indices = @transform_4, window_bounds = array<i64: 128, 128>}, {pipeline_mode = #tpu.pipeline_mode<synchronous>, transform_indices = @transform_5, window_bounds = array<i64: 1, 128>}, {pipeline_mode = #tpu.pipeline_mode<synchronous>, transform_indices = @transform_6, window_bounds = array<i64: 8, 128>}]} {
    %c0 = arith.constant 0 : index
    %c0_0 = arith.constant 0 : index
    %0 = vector.load %arg1[%c0, %c0_0] : memref<8x32xf32, #tpu.memory_space<vmem>>, vector<8x32xf32>
    %1 = arith.truncf %0 : vector<8x32xf32> to vector<8x32xbf16>
    %c0_1 = arith.constant 0 : index
    %c0_2 = arith.constant 0 : index
    %2 = vector.load %arg2[%c0_1, %c0_2] : memref<32x128xbf16, #tpu.memory_space<vmem>>, vector<32x128xbf16>
    %cst = arith.constant dense<0.000000e+00> : vector<8x128xf32>
    %3 = tpu.matmul %1, %2, %cst {dimension_numbers = #tpu.dot_dimension_numbers<[1], [0], [0], [1], [0, 0, 1, 1], [], []>} : vector<8x32xbf16>, vector<32x128xbf16>, vector<8x128xf32> -> vector<8x128xf32>
    %cst_3 = arith.constant dense<0.000000e+00> : vector<128xf32>
    %4 = vector.multi_reduction <add>, %3, %cst_3 [0] : vector<8x128xf32> to vector<128xf32>
    %5 = vector.shape_cast %4 : vector<128xf32> to vector<1x128xf32>
    %6 = arith.mulf %3, %3 : vector<8x128xf32>
    %cst_4 = arith.constant dense<0.000000e+00> : vector<128xf32>
    %7 = vector.multi_reduction <add>, %6, %cst_4 [0] : vector<8x128xf32> to vector<128xf32>
    %8 = vector.shape_cast %7 : vector<128xf32> to vector<1x128xf32>
    %cst_5 = arith.constant 1.250000e-01 : f32
    %9 = vector.broadcast %cst_5 : f32 to vector<1x128xf32>
    %10 = arith.mulf %5, %9 : vector<1x128xf32>
    %cst_6 = arith.constant 1.250000e-01 : f32
    %11 = vector.broadcast %cst_6 : f32 to vector<1x128xf32>
    %12 = arith.mulf %8, %11 : vector<1x128xf32>
    %13 = arith.mulf %10, %10 : vector<1x128xf32>
    %14 = arith.subf %12, %13 : vector<1x128xf32>
    %cst_7 = arith.constant 0.000000e+00 : f32
    %15 = vector.broadcast %cst_7 : f32 to vector<1x128xf32>
    %16 = arith.maximumf %14, %15 : vector<1x128xf32>
    %c0_8 = arith.constant 0 : index
    %c0_9 = arith.constant 0 : index
    %17 = vector.load %arg3[%c0_8, %c0_9] : memref<1x128xf32, #tpu.memory_space<vmem>>, vector<1x128xf32>
    %cst_10 = arith.constant 9.99999974E-6 : f32
    %18 = vector.broadcast %cst_10 : f32 to vector<1x128xf32>
    %19 = arith.addf %16, %18 : vector<1x128xf32>
    %20 = math.rsqrt %19 : vector<1x128xf32>
    %21 = arith.mulf %17, %20 : vector<1x128xf32>
    %c0_11 = arith.constant 0 : index
    %c0_12 = arith.constant 0 : index
    %22 = vector.load %arg4[%c0_11, %c0_12] : memref<1x128xf32, #tpu.memory_space<vmem>>, vector<1x128xf32>
    %23 = arith.mulf %10, %21 : vector<1x128xf32>
    %24 = arith.subf %22, %23 : vector<1x128xf32>
    %25 = vector.broadcast %21 : vector<1x128xf32> to vector<8x128xf32>
    %26 = arith.mulf %3, %25 : vector<8x128xf32>
    %27 = vector.broadcast %24 : vector<1x128xf32> to vector<8x128xf32>
    %28 = arith.addf %26, %27 : vector<8x128xf32>
    %cst_13 = arith.constant 0.000000e+00 : f32
    %29 = vector.broadcast %cst_13 : f32 to vector<8x128xf32>
    %30 = arith.maximumf %28, %29 : vector<8x128xf32>
    %31 = arith.truncf %30 : vector<8x128xf32> to vector<8x128xbf16>
    %c0_14 = arith.constant 0 : index
    %c0_15 = arith.constant 0 : index
    %32 = vector.load %arg5[%c0_14, %c0_15] : memref<128x128xbf16, #tpu.memory_space<vmem>>, vector<128x128xbf16>
    %cst_16 = arith.constant dense<0.000000e+00> : vector<8x128xf32>
    %33 = tpu.matmul %31, %32, %cst_16 {dimension_numbers = #tpu.dot_dimension_numbers<[1], [0], [0], [1], [0, 0, 1, 1], [], []>} : vector<8x128xbf16>, vector<128x128xbf16>, vector<8x128xf32> -> vector<8x128xf32>
    %c0_17 = arith.constant 0 : index
    %c0_18 = arith.constant 0 : index
    %34 = vector.load %arg6[%c0_17, %c0_18] : memref<1x128xf32, #tpu.memory_space<vmem>>, vector<1x128xf32>
    %35 = vector.broadcast %34 : vector<1x128xf32> to vector<8x128xf32>
    %36 = arith.addf %33, %35 : vector<8x128xf32>
    %c0_19 = arith.constant 0 : index
    %c0_20 = arith.constant 0 : index
    %37 = vector.load %arg7[%c0_19, %c0_20] : memref<8x128xf32, #tpu.memory_space<vmem>>, vector<8x128xf32>
    tpu.vector_store %arg7[%c0_19, %c0_20], %36 {strides = array<i32>} : memref<8x128xf32, #tpu.memory_space<vmem>>, vector<8x128xf32>,
    return
  }
  func.func @transform_0(%arg0: i32) -> (i32, i32) {
    %c0_i32 = arith.constant 0 : i32
    %c0_i32_0 = arith.constant 0 : i32
    %c0_i32_1 = arith.constant 0 : i32
    return %c0_i32, %c0_i32_0 : i32, i32
  }
  func.func @transform_1(%arg0: i32) -> (i32, i32) {
    %c0_i32 = arith.constant 0 : i32
    %c0_i32_0 = arith.constant 0 : i32
    %c0_i32_1 = arith.constant 0 : i32
    return %c0_i32, %c0_i32_0 : i32, i32
  }
  func.func @transform_2(%arg0: i32) -> (i32, i32) {
    %c0_i32 = arith.constant 0 : i32
    %c0_i32_0 = arith.constant 0 : i32
    %c0_i32_1 = arith.constant 0 : i32
    return %c0_i32, %c0_i32_0 : i32, i32
  }
  func.func @transform_3(%arg0: i32) -> (i32, i32) {
    %c0_i32 = arith.constant 0 : i32
    %c0_i32_0 = arith.constant 0 : i32
    %c0_i32_1 = arith.constant 0 : i32
    return %c0_i32, %c0_i32_0 : i32, i32
  }
  func.func @transform_4(%arg0: i32) -> (i32, i32) {
    %c0_i32 = arith.constant 0 : i32
    %c0_i32_0 = arith.constant 0 : i32
    %c0_i32_1 = arith.constant 0 : i32
    return %c0_i32, %c0_i32_0 : i32, i32
  }
  func.func @transform_5(%arg0: i32) -> (i32, i32) {
    %c0_i32 = arith.constant 0 : i32
    %c0_i32_0 = arith.constant 0 : i32
    %c0_i32_1 = arith.constant 0 : i32
    return %c0_i32, %c0_i32_0 : i32, i32
  }
  func.func @transform_6(%arg0: i32) -> (i32, i32) {
    %c0_i32 = arith.constant 0 : i32
    %c0_i32_0 = arith.constant 0 : i32
    %c0_i32_1 = arith.constant 0 : i32
    return %c0_i32, %c0_i32_0 : i32, i32
  }
}

</mosaic_0001>

<bundles_post_ra>
// kernel: multitask_forward_packed.1
= control target key start
LH: loop header
LB: loop body
LE: loop exit
PB: predicated region body
PF: predicated region fallthrough
CT: control target
= control target key end

     0   :  { %11 = vsyncpa [#allocation3], 0  ;;  %s482_s0 = inlined_call_operand.hbm [shape: f32[8,32], index: 0, kind: input, shape index: {}]   ;;  %s483_s1 = inlined_call_operand.hbm [shape: bf16[32,128], index: 1, kind: input, shape index: {}]   ;;  %s484_s2 = inlined_call_operand.vmem [shape: f32[1,128], index: 2, kind: input, shape index: {}]   ;;  %s485_s3 = inlined_call_operand.vmem [shape: f32[1,128], index: 3, kind: input, shape index: {}]   ;;  %s486_s4 = inlined_call_operand.hbm [shape: bf16[128,128], index: 4, kind: input, shape index: {}]   ;;  %s487_s5 = inlined_call_operand.vmem [shape: f32[1,128], index: 5, kind: input, shape index: {}]   ;;  %s488_s6 = inlined_call_operand.vmem [shape: f32[8,128], index: 6, kind: output, shape index: {}]  }
   0x1   :  { %12 = vsyncpa [#allocation5], 0  ;;  %s419_s21 = smov [#allocation4]  }
   0x2   :  { %s28_s22 = sshll.u32 %s419_s21, 4  ;;  %s29_s22 = int_to_ptr.vmem [resolvable:$true] %s28_s22 }
   0x3   :  { %s363_s23 = scalar_lea.vmem %s29_s22, 256  ;;  %p368_p1 = scmp.lt.s32.totalorder %s29_s22, %s29_s22 }
   0x4   :  { %p364_p0 = scmp.ne.s32.totalorder %s29_s22, %s363_s23  ;;  %p369_p2 = scmp.lt.s32.totalorder %s363_s23, %s363_s23 }
   0x6   :  { %p370_p3 = por %p369_p2, %p368_p1 }
   0x8   :  { %p371_p4 = pnand %p370_p3, %p364_p0 }
   0xa   :  { %374 = shalt.err (!%p371_p4)
}
   0xb   :  { %s420_s24 = smov 64   ;;  %s421_s25 = smov 4  }
   0xc   :  { %34 = dma.hbm_to_vmem [thread:$0]  %s483_s1, 256, %s29_s22, [#allocation5], %s420_s24, %s420_s24, %s421_s25  }
   0xd   :  { %s422_s28 = smov [#allocation2]   ;;  %s423_s30 = smov [#allocation6]  }
   0xe   :  { %s19_s29 = sshll.u32 %s422_s28, 4  ;;  %s44_s7 = sshll.u32 %s423_s30, 4  ;;  %s20_s29 = int_to_ptr.vmem [resolvable:$true] %s19_s29  ;;  %s45_s7 = int_to_ptr.vmem [resolvable:$true] %s44_s7 }
   0xf   :  { %s383_s8 = scalar_lea.vmem %s20_s29, 128  ;;  %p388_p6 = scmp.lt.s32.totalorder %s20_s29, %s20_s29 }
  0x10   :  { %p384_p5 = scmp.ne.s32.totalorder %s20_s29, %s383_s8  ;;  %p389_p7 = scmp.lt.s32.totalorder %s383_s8, %s383_s8 }
  0x12   :  { %p390_p8 = por %p389_p7, %p388_p6 }
  0x14   :  { %p391_p9 = pnand %p390_p8, %p384_p5 }
  0x16   :  { %394 = shalt.err (!%p391_p9)
}
  0x17   :  { %22 = dma.hbm_to_vmem [thread:$0]  %s482_s0, 128, %s20_s29, [#allocation3]  }
  0x18   :  { %s403_s11 = scalar_lea.vmem %s45_s7, 1024  ;;  %p408_p11 = scmp.lt.s32.totalorder %s45_s7, %s45_s7 }
  0x19   :  { %p404_p10 = scmp.ne.s32.totalorder %s45_s7, %s403_s11  ;;  %p409_p12 = scmp.lt.s32.totalorder %s403_s11, %s403_s11 }
  0x1b   :  { %p410_p13 = por %p409_p12, %p408_p11 }
  0x1d   :  { %p411_p0 = pnand %p410_p13, %p404_p10 }
  0x1f   :  { %414 = shalt.err (!%p411_p0)
}
  0x20   :  { %50 = dma.hbm_to_vmem [thread:$0]  %s486_s4, 1024, %s45_s7, [#allocation5], %s420_s24, %s420_s24, %s421_s25  }
  0x21   :  { %415 = dma.done.wait [#allocation3], 128  }
  0x22   :  { %416 = vsyncadd [#allocation3], 4294967168 }
  0x23   :  { %417 = dma.done.wait [#allocation5], 1280  }
  0x24   :  { %418 = vsyncadd [#allocation5], 4294966016  ;;  %v424_v0 = vmov 0.0   ;;  %vm425_vm0 = vmmov 0   ;;  %v343_v1 = vld [vmem:[#allocation4 + $0x8] sm:$0xff]   ;;  %v344_v2 = vld [vmem:[#allocation4] sm:$0xff]   ;;  %v151_v36 = vlaneseq }
  0x25   :  { %308 = vmatprep.subr.bf16.mxu0 %v424_v0  ;;  %312 = vmatprep.mubr.msk.bf16.mxu0 %vm425_vm0, %v424_v0  ;;  %v63_v3 = vld [vmem:[#allocation2] sm:$0xff]  ;;  %vm81_vm1 = vcmask 261120   ;;  %v345_v5 = vld [vmem:[#allocation6 + $0x38] sm:$0xff]   ;;  %v346_v6 = vld [vmem:[#allocation6 + $0x30] sm:$0xff]  }
  0x26   :  { %316 = vmatprep.subr.bf16.mxu1 %v424_v0  ;;  %332 = vmatprep.mubr.msk.bf16.mxu1 %vm425_vm0, %v424_v0  ;;  %v64_v4 = vpack.c.bf16 %v63_v3, %v63_v3  ;;  %v347_v7 = vld [vmem:[#allocation6 + $0x28] sm:$0xff]   ;;  %v348_v8 = vld [vmem:[#allocation6 + $0x20] sm:$0xff]   ;;  %v349_v9 = vld [vmem:[#allocation6 + $0x18] sm:$0xff]   ;;  %v152_v37 = vshrl.u32 %v151_v36, 7 }
  0x27   :  { %309 = vmatpush3.bf16.msra.mxu0 %v343_v1  ;;  %317 = vmatpush3.bf16.msra.mxu1 %v345_v5  ;;  %v350_v10 = vld [vmem:[#allocation6 + $0x10] sm:$0xff]   ;;  %v351_v11 = vld [vmem:[#allocation6 + $0x8] sm:$0xff]   ;;  %v352_v12 = vld [vmem:[#allocation6] sm:$0xff]  }
  0x28   :  { %310 = vmatprep.subr.bf16.mxu0 %v424_v0  ;;  %318 = vmatprep.subr.bf16.mxu1 %v424_v0  ;;  %v143_v38 = vld [vmem:[%s484_s2] sm:$0x1]  ;;  %v153_v39 = vsub.s32 0, %v152_v37 }
  0x29   :  { %v147_v42 = vld [vmem:[%s485_s3] sm:$0x1] }
  0x2a   :  { %v287_v51 = vld [vmem:[%s487_s5] ss:$0 sm:$0xff] }
  0x2b   :  { %311 = vmatpush3.bf16.msra.mxu0 %v344_v2  ;;  %319 = vmatpush3.bf16.msra.mxu1 %v346_v6 }
  0x2c   :  { %320 = vmatprep.subr.bf16.mxu1 %v424_v0 }
  0x2e   :  { %313 = vmatmul.mubr.msk.bf16.vlgmr.msra.gmra.mxu0 %vm81_vm1, %v64_v4 }
  0x2f   :  { %321 = vmatpush3.bf16.msra.mxu1 %v347_v7 }
  0x30   :  { %322 = vmatprep.subr.bf16.mxu1 %v424_v0 }
  0x33   :  { %323 = vmatpush3.bf16.msra.mxu1 %v348_v8 }
  0x34   :  { %324 = vmatprep.subr.bf16.mxu1 %v424_v0 }
  0x37   :  { %325 = vmatpush3.bf16.msra.mxu1 %v349_v9 }
  0x38   :  { %326 = vmatprep.subr.bf16.mxu1 %v424_v0 }
  0x3b   :  { %327 = vmatpush3.bf16.msra.mxu1 %v350_v10 }
  0x3c   :  { %328 = vmatprep.subr.bf16.mxu1 %v424_v0 }
  0x3f   :  { %329 = vmatpush3.bf16.msra.mxu1 %v351_v11 }
  0x40   :  { %330 = vmatprep.subr.bf16.mxu1 %v424_v0 }
  0x43   :  { %331 = vmatpush3.bf16.msra.mxu1 %v352_v12 }
  0xee   :  { %v119_v13 = vpop.f32.mrf.mxu0 }
  0xef   :  { %v125_v14 = vrot.slane %v119_v13, 4  ;;  %v131_v15 = vmul.f32 %v119_v13, %v119_v13 }
  0xf0   :  { %v314_v16 = vpop.f32.mrf.mxu0 }
  0xf1   :  { %v126_v17 = vadd.f32 %v125_v14, %v119_v13  ;;  %v132_v18 = vrot.slane %v131_v15, 4 }
  0xf2   :  { %v122_v19 = vpop.f32.mrf.mxu0 }
  0xf3   :  { %v127_v20 = vrot.slane %v126_v17, 2  ;;  %v133_v21 = vadd.f32 %v132_v18, %v131_v15 }
  0xf4   :  { %v315_v22 = vpop.f32.mrf.mxu0 }
  0xf5   :  { %v128_v23 = vadd.f32 %v127_v20, %v126_v17  ;;  %v134_v24 = vrot.slane %v133_v21, 2 }
  0xf7   :  { %v129_v25 = vrot.slane %v128_v23, 1  ;;  %v135_v26 = vadd.f32 %v134_v24, %v133_v21 }
  0xf9   :  { %v130_v27 = vadd.f32 %v129_v25, %v128_v23  ;;  %v136_v28 = vrot.slane %v135_v26, 1 }
  0xfb   :  { %v137_v29 = vadd.f32 %v136_v28, %v135_v26  ;;  %v138_v30 = vmul.f32 0.125, %v130_v27 }
  0xfd   :  { %v139_v31 = vmul.f32 0.125, %v137_v29  ;;  %v140_v32 = vmul.f32 %v138_v30, %v138_v30 }
  0xff   :  { %v141_v33 = vsub.f32 %v139_v31, %v140_v32 }
 0x101   :  { %v142_v34 = vmax.f32 %v141_v33, 0.0 }
 0x103   :  { %v144_v35 = vadd.f32 1e-05, %v142_v34 }
 0x105   :  { %353 = vrsqrt.f32 %v144_v35 }
 0x112   :  { %v354_v40 = vpop.eup %353 }
 0x113   :  { %v146_v41 = vmul.f32 %v354_v40, %v143_v38 }
 0x115   :  { %v154_v43 = vrot.slane %v146_v41, %v153_v39  ;;  %v148_v44 = vmul.f32 %v146_v41, %v138_v30 }
 0x117   :  { %v149_v45 = vsub.f32 %v147_v42, %v148_v44  ;;  %v156_v46 = vmul.f32 %v154_v43, %v119_v13 }
 0x119   :  { %v161_v47 = vrot.slane %v149_v45, %v153_v39 }
 0x11b   :  { %v163_v48 = vadd.f32 %v161_v47, %v156_v46 }
 0x11d   :  { %v164_v49 = vmax.f32 %v163_v48, 0.0 }
 0x11f   :  { %v165_v50 = vpack.c.bf16 %v164_v49, %v164_v49 }
 0x121   :  { %333 = vmatmul.mubr.bf16.vlgmr.msra.gmra.mxu1 %v165_v50 }
 0x1e1   :  { %v271_v52 = vpop.f32.mrf.mxu1 }
 0x1e2   :  { %v272_v53 = vadd.f32 %v287_v51, %v271_v52 }
 0x1e3   :  { %v334_v54 = vpop.f32.mrf.mxu1 }
 0x1e4   :  { %277 = vst [vmem:[%s488_s6] sm:$0xff] %v272_v53 }
 0x1e5   :  { %v274_v55 = vpop.f32.mrf.mxu1 }
 0x1e7   :  { %v335_v56 = vpop.f32.mrf.mxu1 }
 0x1e8   :  { %282 = vsyncpa [#allocation3], 1 }
 0x1e9   :  { %283 = vsyncpa [#allocation5], 1 }

</bundles_post_ra>
